<compile_context>
chip_gen: v7x
topology: tpu7x:2x2x1
jax: 0.10.0
libtpu: 0.0.40
codegen_flags: <defaults>
</compile_context>

<pallas_src>
import math
import functools

import jax
import jax.numpy as jnp
from jax.experimental import pallas as pl
from jax.experimental.pallas import tpu as pltpu

LANE = 128


def _round_up(a, m):
    return ((a + m - 1) // m) * m


def _gcn_kernel(x_ref, adj_ref, w1_ref, b1_ref, w2_ref, b2_ref, out_ref, *, fout):
    """One batch tile of tb graphs.

    x_ref   : (tb*K, Fin)   compute dtype (bf16 or f32)
    adj_ref : (tb, K, K)    f32 (VPU-only operand)
    w1_ref  : (Fin, Hp)     compute dtype, hidden dim zero-padded to 128
    b1_ref  : (1, Hp)       f32
    w2_ref  : (Hp, Fp)      compute dtype, output dim zero-padded to 128
    b2_ref  : (1, Fp)       f32
    out_ref : (1, tb, Pp)   f32, packed: lanes [k*fout:(k+1)*fout] = node k's features
    """
    tb, K, _ = adj_ref.shape
    Hp = w1_ref.shape[1]
    Fp = w2_ref.shape[1]
    Pp = out_ref.shape[2]

    adj = adj_ref[...]                                            # (tb, K, K) f32

    # ---- Layer 1 -------------------------------------------------------------
    # One fused MXU matmul over all tb*K node rows: (tb*K, Fin) @ (Fin, Hp).
    s1 = jnp.dot(x_ref[...], w1_ref[...],
                 preferred_element_type=jnp.float32)              # (tb*K, Hp) f32
    s1 = s1.reshape(tb, K, Hp)                                    # leading-dim split, free

    # Neighborhood aggregation: unrolled VPU broadcast-FMA over the K source nodes
    # (no tiny per-graph MXU matmuls, f32 throughout).
    h = adj[:, :, 0:1] * s1[:, 0:1, :]                            # (tb, K, Hp) f32
    for j in range(1, K):
        h = h + adj[:, :, j:j + 1] * s1[:, j:j + 1, :]

    # Bias + ReLU epilogue in f32 on the 2-D slab (clean (1, Hp) broadcast).
    h2 = jnp.maximum(h.reshape(tb * K, Hp) + b1_ref[...], 0.0)    # (tb*K, Hp) f32

    # Dropout: identity in eval mode.

    # ---- Layer 2 -------------------------------------------------------------
    s2 = jnp.dot(h2.astype(w2_ref.dtype), w2_ref[...],
                 preferred_element_type=jnp.float32)              # (tb*K, Fp) f32
    s2 = s2.reshape(tb, K, Fp)

    o = adj[:, :, 0:1] * s2[:, 0:1, :]                            # (tb, K, Fp) f32
    for j in range(1, K):
        o = o + adj[:, :, j:j + 1] * s2[:, j:j + 1, :]
    o = o + b2_ref[...]                                           # (1, Fp) broadcast

    # ---- Packed, lane-dense store --------------------------------------------
    # out[b, k*fout + f] = o[b, k, f]  — no 128-lane zero padding per node row.
    if Pp > K * fout:  # general-shape tail padding (not hit for K*Fout == 128)
        out_ref[0, :, K * fout:] = jnp.zeros((tb, Pp - K * fout), out_ref.dtype)
    for k in range(K):
        out_ref[0, :, k * fout:(k + 1) * fout] = o[:, k, :fout].astype(out_ref.dtype)


@functools.partial(jax.jit, static_argnames=("block_b", "compute_dtype"))
def gcn_forward(x, adj, w1, b1, w2, b2, *, block_b=128, compute_dtype=jnp.bfloat16):
    """x: (B, K, Fin) f32, adj: (B, K, K) f32, w1: (Fin, H), b1: (H,),
    w2: (H, Fout), b2: (Fout,). Returns (B, K, Fout) f32.

    compute_dtype controls the MXU matmul operand dtype only (bf16 halves HBM
    traffic; pass jnp.float32 for full fidelity to the f32 PyTorch module).
    """
    B, K, Fin = x.shape
    H = w1.shape[1]
    Fout = w2.shape[1]

    Hp = _round_up(H, LANE)          # padded hidden width (MXU N, lane aligned)
    Fp = _round_up(Fout, LANE)       # padded layer-2 width
    P = K * Fout                     # packed output width per graph
    Pp = _round_up(P, LANE)

    # Batch tile: at least 2 grid steps when B >= 2 (so v7x's two TensorCores both
    # get work via the "parallel" axis), capped at block_b graphs per step, and
    # rounded so tb*K stays a multiple of 8 (sublane-aligned x block).
    tb = max(1, min(block_b, -(-B // 2)))
    step = max(1, 8 // math.gcd(K, 8))
    tb = _round_up(tb, step)
    nb = -(-B // tb)
    Bp = nb * tb

    # Matmul operands in the compute dtype; adjacency stays f32 (VPU-only, item 7).
    xc = x.astype(compute_dtype)
    adjf = adj.astype(jnp.float32)
    if Bp != B:
        pad = Bp - B
        xc = jnp.pad(xc, ((0, pad), (0, 0), (0, 0)))
        adjf = jnp.pad(adjf, ((0, pad), (0, 0), (0, 0)))
    x2d = xc.reshape(Bp * K, Fin)    # 2-D slab -> one fused weight matmul per layer

    # Zero-pad hidden/output feature dims to 128 lanes; padded hidden columns stay
    # exactly zero through bias(=0) + relu, padded output columns are never stored.
    w1p = jnp.zeros((Fin, Hp), compute_dtype).at[:, :H].set(w1.astype(compute_dtype))
    b1p = jnp.zeros((1, Hp), jnp.float32).at[:, :H].set(b1.astype(jnp.float32))
    w2p = jnp.zeros((Hp, Fp), compute_dtype).at[:H, :Fout].set(w2.astype(compute_dtype))
    b2p = jnp.zeros((1, Fp), jnp.float32).at[:, :Fout].set(b2.astype(jnp.float32))

    out3d = pl.pallas_call(
        functools.partial(_gcn_kernel, fout=Fout),
        out_shape=jax.ShapeDtypeStruct((nb, tb, Pp), jnp.float32),
        grid_spec=pltpu.PrefetchScalarGridSpec(
            num_scalar_prefetch=0,
            grid=(nb,),
            in_specs=[
                pl.BlockSpec((tb * K, Fin), lambda i: (i, 0)),   # node features (2-D slab)
                pl.BlockSpec((tb, K, K), lambda i: (i, 0, 0)),   # adjacency (f32)
                pl.BlockSpec((Fin, Hp), lambda i: (0, 0)),       # W1 (padded)
                pl.BlockSpec((1, Hp), lambda i: (0, 0)),         # b1 (2-D, lane aligned)
                pl.BlockSpec((Hp, Fp), lambda i: (0, 0)),        # W2 (padded)
                pl.BlockSpec((1, Fp), lambda i: (0, 0)),         # b2 (2-D, lane aligned)
            ],
            # 3-D output block: last two dims equal the full array dims, so any
            # small tb is legal, and the (tb, Pp) store is fully lane-dense.
            out_specs=pl.BlockSpec((1, tb, Pp), lambda i: (i, 0, 0)),
        ),
        compiler_params=pltpu.CompilerParams(
            dimension_semantics=("parallel",),
            vmem_limit_bytes=32 << 20,   # headroom for larger block_b on v5e/v6e
        ),
    )(x2d, adjf, w1p, b1p, w2p, b2p)

    out2d = out3d.reshape(Bp, Pp)
    return out2d[:B, :P].reshape(B, K, Fout)


def init_gcn_params(key, in_feat_dim, nhid, out_feat_dim):
    """Mimics GraphConvolution.reset_parameters: uniform(-stdv, stdv), stdv=1/sqrt(out)."""
    k1, k2, k3, k4 = jax.random.split(key, 4)
    stdv1 = 1.0 / math.sqrt(nhid)
    stdv2 = 1.0 / math.sqrt(out_feat_dim)
    w1 = jax.random.uniform(k1, (in_feat_dim, nhid), jnp.float32, -stdv1, stdv1)
    b1 = jax.random.uniform(k2, (nhid,), jnp.float32, -stdv1, stdv1)
    w2 = jax.random.uniform(k3, (nhid, out_feat_dim), jnp.float32, -stdv2, stdv2)
    b2 = jax.random.uniform(k4, (out_feat_dim,), jnp.float32, -stdv2, stdv2)
    return w1, b1, w2, b2


def gcn_reference(x, adj, w1, b1, w2, b2):
    """Pure-JAX f32 reference of the PyTorch module (HIGHEST matmul precision)."""
    hp = jax.lax.Precision.HIGHEST
    s1 = jnp.einsum('bkf,fh->bkh', x, w1, precision=hp)
    h = jnp.maximum(jnp.einsum('bkj,bjh->bkh', adj, s1, precision=hp) + b1, 0.0)
    s2 = jnp.einsum('bkh,hf->bkf', h, w2, precision=hp)
    return jnp.einsum('bkj,bjf->bkf', adj, s2, precision=hp) + b2


if __name__ == "__main__":
    # Small shapes consistent with the module:
    #   graph_nodes: (B, K, in_feat_dim), adjacency: (B, K, K)
    B, K, in_feat_dim, nhid, out_feat_dim = 7, 8, 16, 32, 16

    key = jax.random.PRNGKey(0)
    kx, kadj, kp = jax.random.split(key, 3)

    x = jax.random.normal(kx, (B, K, in_feat_dim), jnp.float32)
    # Row-normalized random adjacency (typical GCN-style adj)
    adj_raw = jax.random.uniform(kadj, (B, K, K), jnp.float32)
    adj = adj_raw / jnp.sum(adj_raw, axis=-1, keepdims=True)

    w1, b1, w2, b2 = init_gcn_params(kp, in_feat_dim, nhid, out_feat_dim)

    ref = gcn_reference(x, adj, w1, b1, w2, b2)

    # block_b=4, B=7 -> tb=4, two grid steps, one padded graph: exercises both the
    # tiled path and the batch-padding path.

    # (1) f32 compute dtype: validates against the plain f32 reference (fidelity switch).
    out_f32 = jax.block_until_ready(
        gcn_forward(x, adj, w1, b1, w2, b2, block_b=4, compute_dtype=jnp.float32))
    assert out_f32.shape == (B, K, out_feat_dim)
    err32 = float(jnp.max(jnp.abs(out_f32 - ref)))
    assert jnp.allclose(out_f32, ref, atol=5e-3, rtol=5e-3), (
        f"f32-compute Pallas output mismatch vs f32 reference (max abs err {err32})")

    # (2) default bf16 matmul operands (halved HBM traffic) vs the same f32 reference.
    out_bf16 = jax.block_until_ready(
        gcn_forward(x, adj, w1, b1, w2, b2, block_b=4))
    assert out_bf16.shape == (B, K, out_feat_dim)
    errbf = float(jnp.max(jnp.abs(out_bf16 - ref)))
    assert jnp.allclose(out_bf16, ref, atol=4e-2, rtol=4e-2), (
        f"bf16-compute Pallas output mismatch vs f32 reference (max abs err {errbf})")

    print("KERNEL_OK")
</pallas_src>

<mosaic_0001>
module attributes {stable_mosaic.version = 11 : i64} {
  func.func @_gcn_kernel(%arg0: i32, %arg1: memref<32x16xf32, #tpu.memory_space<vmem>>, %arg2: memref<4x8x8xf32, #tpu.memory_space<vmem>>, %arg3: memref<16x128xf32, #tpu.memory_space<vmem>>, %arg4: memref<1x128xf32, #tpu.memory_space<vmem>>, %arg5: memref<128x128xf32, #tpu.memory_space<vmem>>, %arg6: memref<1x128xf32, #tpu.memory_space<vmem>>, %arg7: memref<1x4x128xf32, #tpu.memory_space<vmem>>) attributes {dimension_semantics = [#tpu.dimension_semantics<parallel>], iteration_bounds = array<i64: 2>, scalar_prefetch = 0 : i64, scratch_operands = 0 : i64, tpu.core_type = #tpu.core_type<tc>, window_params = [{transform_indices = @transform_0, window_bounds = array<i64: 32, 16>}, {transform_indices = @transform_1, window_bounds = array<i64: 4, 8, 8>}, {pipeline_mode = #tpu.pipeline_mode<synchronous>, transform_indices = @transform_2, window_bounds = array<i64: 16, 128>}, {pipeline_mode = #tpu.pipeline_mode<synchronous>, transform_indices = @transform_3, window_bounds = array<i64: 1, 128>}, {pipeline_mode = #tpu.pipeline_mode<synchronous>, transform_indices = @transform_4, window_bounds = array<i64: 128, 128>}, {pipeline_mode = #tpu.pipeline_mode<synchronous>, transform_indices = @transform_5, window_bounds = array<i64: 1, 128>}, {transform_indices = @transform_6, window_bounds = array<i64: 1, 4, 128>}]} {
    %c0 = arith.constant 0 : index
    %c0_0 = arith.constant 0 : index
    %c0_1 = arith.constant 0 : index
    %0 = vector.load %arg2[%c0, %c0_0, %c0_1] : memref<4x8x8xf32, #tpu.memory_space<vmem>>, vector<4x8x8xf32>
    %c0_2 = arith.constant 0 : index
    %c0_3 = arith.constant 0 : index
    %1 = vector.load %arg1[%c0_2, %c0_3] : memref<32x16xf32, #tpu.memory_space<vmem>>, vector<32x16xf32>
    %c0_4 = arith.constant 0 : index
    %c0_5 = arith.constant 0 : index
    %2 = vector.load %arg3[%c0_4, %c0_5] : memref<16x128xf32, #tpu.memory_space<vmem>>, vector<16x128xf32>
    %cst = arith.constant dense<0.000000e+00> : vector<32x128xf32>
    %3 = tpu.matmul %1, %2, %cst {dimension_numbers = #tpu.dot_dimension_numbers<[1], [0], [0], [1], [0, 0, 1, 1], [], []>} : vector<32x16xf32>, vector<16x128xf32>, vector<32x128xf32> -> vector<32x128xf32>
    %4 = vector.shape_cast %3 : vector<32x128xf32> to vector<4x8x128xf32>
    %5 = vector.extract_strided_slice %0 {offsets = [0, 0, 0], sizes = [4, 8, 1], strides = [1, 1, 1]} : vector<4x8x8xf32> to vector<4x8x1xf32>
    %6 = vector.extract_strided_slice %4 {offsets = [0, 0, 0], sizes = [4, 1, 128], strides = [1, 1, 1]} : vector<4x8x128xf32> to vector<4x1x128xf32>
    %7 = vector.broadcast %5 : vector<4x8x1xf32> to vector<4x8x128xf32>
    %8 = vector.broadcast %6 : vector<4x1x128xf32> to vector<4x8x128xf32>
    %9 = arith.mulf %7, %8 : vector<4x8x128xf32>
    %10 = vector.extract_strided_slice %0 {offsets = [0, 0, 1], sizes = [4, 8, 1], strides = [1, 1, 1]} : vector<4x8x8xf32> to vector<4x8x1xf32>
    %11 = vector.extract_strided_slice %4 {offsets = [0, 1, 0], sizes = [4, 1, 128], strides = [1, 1, 1]} : vector<4x8x128xf32> to vector<4x1x128xf32>
    %12 = vector.broadcast %10 : vector<4x8x1xf32> to vector<4x8x128xf32>
    %13 = vector.broadcast %11 : vector<4x1x128xf32> to vector<4x8x128xf32>
    %14 = arith.mulf %12, %13 : vector<4x8x128xf32>
    %15 = arith.addf %9, %14 : vector<4x8x128xf32>
    %16 = vector.extract_strided_slice %0 {offsets = [0, 0, 2], sizes = [4, 8, 1], strides = [1, 1, 1]} : vector<4x8x8xf32> to vector<4x8x1xf32>
    %17 = vector.extract_strided_slice %4 {offsets = [0, 2, 0], sizes = [4, 1, 128], strides = [1, 1, 1]} : vector<4x8x128xf32> to vector<4x1x128xf32>
    %18 = vector.broadcast %16 : vector<4x8x1xf32> to vector<4x8x128xf32>
    %19 = vector.broadcast %17 : vector<4x1x128xf32> to vector<4x8x128xf32>
    %20 = arith.mulf %18, %19 : vector<4x8x128xf32>
    %21 = arith.addf %15, %20 : vector<4x8x128xf32>
    %22 = vector.extract_strided_slice %0 {offsets = [0, 0, 3], sizes = [4, 8, 1], strides = [1, 1, 1]} : vector<4x8x8xf32> to vector<4x8x1xf32>
    %23 = vector.extract_strided_slice %4 {offsets = [0, 3, 0], sizes = [4, 1, 128], strides = [1, 1, 1]} : vector<4x8x128xf32> to vector<4x1x128xf32>
    %24 = vector.broadcast %22 : vector<4x8x1xf32> to vector<4x8x128xf32>
    %25 = vector.broadcast %23 : vector<4x1x128xf32> to vector<4x8x128xf32>
    %26 = arith.mulf %24, %25 : vector<4x8x128xf32>
    %27 = arith.addf %21, %26 : vector<4x8x128xf32>
    %28 = vector.extract_strided_slice %0 {offsets = [0, 0, 4], sizes = [4, 8, 1], strides = [1, 1, 1]} : vector<4x8x8xf32> to vector<4x8x1xf32>
    %29 = vector.extract_strided_slice %4 {offsets = [0, 4, 0], sizes = [4, 1, 128], strides = [1, 1, 1]} : vector<4x8x128xf32> to vector<4x1x128xf32>
    %30 = vector.broadcast %28 : vector<4x8x1xf32> to vector<4x8x128xf32>
    %31 = vector.broadcast %29 : vector<4x1x128xf32> to vector<4x8x128xf32>
    %32 = arith.mulf %30, %31 : vector<4x8x128xf32>
    %33 = arith.addf %27, %32 : vector<4x8x128xf32>
    %34 = vector.extract_strided_slice %0 {offsets = [0, 0, 5], sizes = [4, 8, 1], strides = [1, 1, 1]} : vector<4x8x8xf32> to vector<4x8x1xf32>
    %35 = vector.extract_strided_slice %4 {offsets = [0, 5, 0], sizes = [4, 1, 128], strides = [1, 1, 1]} : vector<4x8x128xf32> to vector<4x1x128xf32>
    %36 = vector.broadcast %34 : vector<4x8x1xf32> to vector<4x8x128xf32>
    %37 = vector.broadcast %35 : vector<4x1x128xf32> to vector<4x8x128xf32>
    %38 = arith.mulf %36, %37 : vector<4x8x128xf32>
    %39 = arith.addf %33, %38 : vector<4x8x128xf32>
    %40 = vector.extract_strided_slice %0 {offsets = [0, 0, 6], sizes = [4, 8, 1], strides = [1, 1, 1]} : vector<4x8x8xf32> to vector<4x8x1xf32>
    %41 = vector.extract_strided_slice %4 {offsets = [0, 6, 0], sizes = [4, 1, 128], strides = [1, 1, 1]} : vector<4x8x128xf32> to vector<4x1x128xf32>
    %42 = vector.broadcast %40 : vector<4x8x1xf32> to vector<4x8x128xf32>
    %43 = vector.broadcast %41 : vector<4x1x128xf32> to vector<4x8x128xf32>
    %44 = arith.mulf %42, %43 : vector<4x8x128xf32>
    %45 = arith.addf %39, %44 : vector<4x8x128xf32>
    %46 = vector.extract_strided_slice %0 {offsets = [0, 0, 7], sizes = [4, 8, 1], strides = [1, 1, 1]} : vector<4x8x8xf32> to vector<4x8x1xf32>
    %47 = vector.extract_strided_slice %4 {offsets = [0, 7, 0], sizes = [4, 1, 128], strides = [1, 1, 1]} : vector<4x8x128xf32> to vector<4x1x128xf32>
    %48 = vector.broadcast %46 : vector<4x8x1xf32> to vector<4x8x128xf32>
    %49 = vector.broadcast %47 : vector<4x1x128xf32> to vector<4x8x128xf32>
    %50 = arith.mulf %48, %49 : vector<4x8x128xf32>
    %51 = arith.addf %45, %50 : vector<4x8x128xf32>
    %52 = vector.shape_cast %51 : vector<4x8x128xf32> to vector<32x128xf32>
    %c0_6 = arith.constant 0 : index
    %c0_7 = arith.constant 0 : index
    %53 = vector.load %arg4[%c0_6, %c0_7] : memref<1x128xf32, #tpu.memory_space<vmem>>, vector<1x128xf32>
    %54 = vector.broadcast %53 : vector<1x128xf32> to vector<32x128xf32>
    %55 = arith.addf %52, %54 : vector<32x128xf32>
    %cst_8 = arith.constant 0.000000e+00 : f32
    %56 = vector.broadcast %cst_8 : f32 to vector<32x128xf32>
    %57 = arith.maximumf %55, %56 : vector<32x128xf32>
    %c0_9 = arith.constant 0 : index
    %c0_10 = arith.constant 0 : index
    %58 = vector.load %arg5[%c0_9, %c0_10] : memref<128x128xf32, #tpu.memory_space<vmem>>, vector<128x128xf32>
    %cst_11 = arith.constant dense<0.000000e+00> : vector<32x128xf32>
    %59 = tpu.matmul %57, %58, %cst_11 {dimension_numbers = #tpu.dot_dimension_numbers<[1], [0], [0], [1], [0, 0, 1, 1], [], []>} : vector<32x128xf32>, vector<128x128xf32>, vector<32x128xf32> -> vector<32x128xf32>
    %60 = vector.shape_cast %59 : vector<32x128xf32> to vector<4x8x128xf32>
    %61 = vector.extract_strided_slice %0 {offsets = [0, 0, 0], sizes = [4, 8, 1], strides = [1, 1, 1]} : vector<4x8x8xf32> to vector<4x8x1xf32>
    %62 = vector.extract_strided_slice %60 {offsets = [0, 0, 0], sizes = [4, 1, 128], strides = [1, 1, 1]} : vector<4x8x128xf32> to vector<4x1x128xf32>
    %63 = vector.broadcast %61 : vector<4x8x1xf32> to vector<4x8x128xf32>
    %64 = vector.broadcast %62 : vector<4x1x128xf32> to vector<4x8x128xf32>
    %65 = arith.mulf %63, %64 : vector<4x8x128xf32>
    %66 = vector.extract_strided_slice %0 {offsets = [0, 0, 1], sizes = [4, 8, 1], strides = [1, 1, 1]} : vector<4x8x8xf32> to vector<4x8x1xf32>
    %67 = vector.extract_strided_slice %60 {offsets = [0, 1, 0], sizes = [4, 1, 128], strides = [1, 1, 1]} : vector<4x8x128xf32> to vector<4x1x128xf32>
    %68 = vector.broadcast %66 : vector<4x8x1xf32> to vector<4x8x128xf32>
    %69 = vector.broadcast %67 : vector<4x1x128xf32> to vector<4x8x128xf32>
    %70 = arith.mulf %68, %69 : vector<4x8x128xf32>
    %71 = arith.addf %65, %70 : vector<4x8x128xf32>
    %72 = vector.extract_strided_slice %0 {offsets = [0, 0, 2], sizes = [4, 8, 1], strides = [1, 1, 1]} : vector<4x8x8xf32> to vector<4x8x1xf32>
    %73 = vector.extract_strided_slice %60 {offsets = [0, 2, 0], sizes = [4, 1, 128], strides = [1, 1, 1]} : vector<4x8x128xf32> to vector<4x1x128xf32>
    %74 = vector.broadcast %72 : vector<4x8x1xf32> to vector<4x8x128xf32>
    %75 = vector.broadcast %73 : vector<4x1x128xf32> to vector<4x8x128xf32>
    %76 = arith.mulf %74, %75 : vector<4x8x128xf32>
    %77 = arith.addf %71, %76 : vector<4x8x128xf32>
    %78 = vector.extract_strided_slice %0 {offsets = [0, 0, 3], sizes = [4, 8, 1], strides = [1, 1, 1]} : vector<4x8x8xf32> to vector<4x8x1xf32>
    %79 = vector.extract_strided_slice %60 {offsets = [0, 3, 0], sizes = [4, 1, 128], strides = [1, 1, 1]} : vector<4x8x128xf32> to vector<4x1x128xf32>
    %80 = vector.broadcast %78 : vector<4x8x1xf32> to vector<4x8x128xf32>
    %81 = vector.broadcast %79 : vector<4x1x128xf32> to vector<4x8x128xf32>
    %82 = arith.mulf %80, %81 : vector<4x8x128xf32>
    %83 = arith.addf %77, %82 : vector<4x8x128xf32>
    %84 = vector.extract_strided_slice %0 {offsets = [0, 0, 4], sizes = [4, 8, 1], strides = [1, 1, 1]} : vector<4x8x8xf32> to vector<4x8x1xf32>
    %85 = vector.extract_strided_slice %60 {offsets = [0, 4, 0], sizes = [4, 1, 128], strides = [1, 1, 1]} : vector<4x8x128xf32> to vector<4x1x128xf32>
    %86 = vector.broadcast %84 : vector<4x8x1xf32> to vector<4x8x128xf32>
    %87 = vector.broadcast %85 : vector<4x1x128xf32> to vector<4x8x128xf32>
    %88 = arith.mulf %86, %87 : vector<4x8x128xf32>
    %89 = arith.addf %83, %88 : vector<4x8x128xf32>
    %90 = vector.extract_strided_slice %0 {offsets = [0, 0, 5], sizes = [4, 8, 1], strides = [1, 1, 1]} : vector<4x8x8xf32> to vector<4x8x1xf32>
    %91 = vector.extract_strided_slice %60 {offsets = [0, 5, 0], sizes = [4, 1, 128], strides = [1, 1, 1]} : vector<4x8x128xf32> to vector<4x1x128xf32>
    %92 = vector.broadcast %90 : vector<4x8x1xf32> to vector<4x8x128xf32>
    %93 = vector.broadcast %91 : vector<4x1x128xf32> to vector<4x8x128xf32>
    %94 = arith.mulf %92, %93 : vector<4x8x128xf32>
    %95 = arith.addf %89, %94 : vector<4x8x128xf32>
    %96 = vector.extract_strided_slice %0 {offsets = [0, 0, 6], sizes = [4, 8, 1], strides = [1, 1, 1]} : vector<4x8x8xf32> to vector<4x8x1xf32>
    %97 = vector.extract_strided_slice %60 {offsets = [0, 6, 0], sizes = [4, 1, 128], strides = [1, 1, 1]} : vector<4x8x128xf32> to vector<4x1x128xf32>
    %98 = vector.broadcast %96 : vector<4x8x1xf32> to vector<4x8x128xf32>
    %99 = vector.broadcast %97 : vector<4x1x128xf32> to vector<4x8x128xf32>
    %100 = arith.mulf %98, %99 : vector<4x8x128xf32>
    %101 = arith.addf %95, %100 : vector<4x8x128xf32>
    %102 = vector.extract_strided_slice %0 {offsets = [0, 0, 7], sizes = [4, 8, 1], strides = [1, 1, 1]} : vector<4x8x8xf32> to vector<4x8x1xf32>
    %103 = vector.extract_strided_slice %60 {offsets = [0, 7, 0], sizes = [4, 1, 128], strides = [1, 1, 1]} : vector<4x8x128xf32> to vector<4x1x128xf32>
    %104 = vector.broadcast %102 : vector<4x8x1xf32> to vector<4x8x128xf32>
    %105 = vector.broadcast %103 : vector<4x1x128xf32> to vector<4x8x128xf32>
    %106 = arith.mulf %104, %105 : vector<4x8x128xf32>
    %107 = arith.addf %101, %106 : vector<4x8x128xf32>
    %c0_12 = arith.constant 0 : index
    %c0_13 = arith.constant 0 : index
    %108 = vector.load %arg6[%c0_12, %c0_13] : memref<1x128xf32, #tpu.memory_space<vmem>>, vector<1x128xf32>
    %109 = vector.shape_cast %108 : vector<1x128xf32> to vector<1x1x128xf32>
    %110 = vector.broadcast %109 : vector<1x1x128xf32> to vector<4x8x128xf32>
    %111 = arith.addf %107, %110 : vector<4x8x128xf32>
    %112 = vector.extract_strided_slice %111 {offsets = [0, 0, 0], sizes = [4, 1, 16], strides = [1, 1, 1]} : vector<4x8x128xf32> to vector<4x1x16xf32>
    %113 = vector.shape_cast %112 : vector<4x1x16xf32> to vector<4x16xf32>
    %c0_14 = arith.constant 0 : index
    %c0_15 = arith.constant 0 : index
    %c0_16 = arith.constant 0 : index
    %114 = vector.load %arg7[%c0_14, %c0_15, %c0_16] : memref<1x4x128xf32, #tpu.memory_space<vmem>>, vector<1x4x16xf32>
    %115 = vector.shape_cast %114 : vector<1x4x16xf32> to vector<4x16xf32>
    %116 = vector.shape_cast %113 : vector<4x16xf32> to vector<1x4x16xf32>
    tpu.vector_store %arg7[%c0_14, %c0_15, %c0_16], %116 {strides = array<i32>} : memref<1x4x128xf32, #tpu.memory_space<vmem>>, vector<1x4x16xf32>,
    %117 = vector.extract_strided_slice %111 {offsets = [0, 1, 0], sizes = [4, 1, 16], strides = [1, 1, 1]} : vector<4x8x128xf32> to vector<4x1x16xf32>
    %118 = vector.shape_cast %117 : vector<4x1x16xf32> to vector<4x16xf32>
    %c0_17 = arith.constant 0 : index
    %c0_18 = arith.constant 0 : index
    %c16 = arith.constant 16 : index
    %119 = vector.load %arg7[%c0_17, %c0_18, %c16] : memref<1x4x128xf32, #tpu.memory_space<vmem>>, vector<1x4x16xf32>
    %120 = vector.shape_cast %119 : vector<1x4x16xf32> to vector<4x16xf32>
    %121 = vector.shape_cast %118 : vector<4x16xf32> to vector<1x4x16xf32>
    tpu.vector_store %arg7[%c0_17, %c0_18, %c16], %121 {strides = array<i32>} : memref<1x4x128xf32, #tpu.memory_space<vmem>>, vector<1x4x16xf32>,
    %122 = vector.extract_strided_slice %111 {offsets = [0, 2, 0], sizes = [4, 1, 16], strides = [1, 1, 1]} : vector<4x8x128xf32> to vector<4x1x16xf32>
    %123 = vector.shape_cast %122 : vector<4x1x16xf32> to vector<4x16xf32>
    %c0_19 = arith.constant 0 : index
    %c0_20 = arith.constant 0 : index
    %c32 = arith.constant 32 : index
    %124 = vector.load %arg7[%c0_19, %c0_20, %c32] : memref<1x4x128xf32, #tpu.memory_space<vmem>>, vector<1x4x16xf32>
    %125 = vector.shape_cast %124 : vector<1x4x16xf32> to vector<4x16xf32>
    %126 = vector.shape_cast %123 : vector<4x16xf32> to vector<1x4x16xf32>
    tpu.vector_store %arg7[%c0_19, %c0_20, %c32], %126 {strides = array<i32>} : memref<1x4x128xf32, #tpu.memory_space<vmem>>, vector<1x4x16xf32>,
    %127 = vector.extract_strided_slice %111 {offsets = [0, 3, 0], sizes = [4, 1, 16], strides = [1, 1, 1]} : vector<4x8x128xf32> to vector<4x1x16xf32>
    %128 = vector.shape_cast %127 : vector<4x1x16xf32> to vector<4x16xf32>
    %c0_21 = arith.constant 0 : index
    %c0_22 = arith.constant 0 : index
    %c48 = arith.constant 48 : index
    %129 = vector.load %arg7[%c0_21, %c0_22, %c48] : memref<1x4x128xf32, #tpu.memory_space<vmem>>, vector<1x4x16xf32>
    %130 = vector.shape_cast %129 : vector<1x4x16xf32> to vector<4x16xf32>
    %131 = vector.shape_cast %128 : vector<4x16xf32> to vector<1x4x16xf32>
    tpu.vector_store %arg7[%c0_21, %c0_22, %c48], %131 {strides = array<i32>} : memref<1x4x128xf32, #tpu.memory_space<vmem>>, vector<1x4x16xf32>,
    %132 = vector.extract_strided_slice %111 {offsets = [0, 4, 0], sizes = [4, 1, 16], strides = [1, 1, 1]} : vector<4x8x128xf32> to vector<4x1x16xf32>
    %133 = vector.shape_cast %132 : vector<4x1x16xf32> to vector<4x16xf32>
    %c0_23 = arith.constant 0 : index
    %c0_24 = arith.constant 0 : index
    %c64 = arith.constant 64 : index
    %134 = vector.load %arg7[%c0_23, %c0_24, %c64] : memref<1x4x128xf32, #tpu.memory_space<vmem>>, vector<1x4x16xf32>
    %135 = vector.shape_cast %134 : vector<1x4x16xf32> to vector<4x16xf32>
    %136 = vector.shape_cast %133 : vector<4x16xf32> to vector<1x4x16xf32>
    tpu.vector_store %arg7[%c0_23, %c0_24, %c64], %136 {strides = array<i32>} : memref<1x4x128xf32, #tpu.memory_space<vmem>>, vector<1x4x16xf32>,
    %137 = vector.extract_strided_slice %111 {offsets = [0, 5, 0], sizes = [4, 1, 16], strides = [1, 1, 1]} : vector<4x8x128xf32> to vector<4x1x16xf32>
    %138 = vector.shape_cast %137 : vector<4x1x16xf32> to vector<4x16xf32>
    %c0_25 = arith.constant 0 : index
    %c0_26 = arith.constant 0 : index
    %c80 = arith.constant 80 : index
    %139 = vector.load %arg7[%c0_25, %c0_26, %c80] : memref<1x4x128xf32, #tpu.memory_space<vmem>>, vector<1x4x16xf32>
    %140 = vector.shape_cast %139 : vector<1x4x16xf32> to vector<4x16xf32>
    %141 = vector.shape_cast %138 : vector<4x16xf32> to vector<1x4x16xf32>
    tpu.vector_store %arg7[%c0_25, %c0_26, %c80], %141 {strides = array<i32>} : memref<1x4x128xf32, #tpu.memory_space<vmem>>, vector<1x4x16xf32>,
    %142 = vector.extract_strided_slice %111 {offsets = [0, 6, 0], sizes = [4, 1, 16], strides = [1, 1, 1]} : vector<4x8x128xf32> to vector<4x1x16xf32>
    %143 = vector.shape_cast %142 : vector<4x1x16xf32> to vector<4x16xf32>
    %c0_27 = arith.constant 0 : index
    %c0_28 = arith.constant 0 : index
    %c96 = arith.constant 96 : index
    %144 = vector.load %arg7[%c0_27, %c0_28, %c96] : memref<1x4x128xf32, #tpu.memory_space<vmem>>, vector<1x4x16xf32>
    %145 = vector.shape_cast %144 : vector<1x4x16xf32> to vector<4x16xf32>
    %146 = vector.shape_cast %143 : vector<4x16xf32> to vector<1x4x16xf32>
    tpu.vector_store %arg7[%c0_27, %c0_28, %c96], %146 {strides = array<i32>} : memref<1x4x128xf32, #tpu.memory_space<vmem>>, vector<1x4x16xf32>,
    %147 = vector.extract_strided_slice %111 {offsets = [0, 7, 0], sizes = [4, 1, 16], strides = [1, 1, 1]} : vector<4x8x128xf32> to vector<4x1x16xf32>
    %148 = vector.shape_cast %147 : vector<4x1x16xf32> to vector<4x16xf32>
    %c0_29 = arith.constant 0 : index
    %c0_30 = arith.constant 0 : index
    %c112 = arith.constant 112 : index
    %149 = vector.load %arg7[%c0_29, %c0_30, %c112] : memref<1x4x128xf32, #tpu.memory_space<vmem>>, vector<1x4x16xf32>
    %150 = vector.shape_cast %149 : vector<1x4x16xf32> to vector<4x16xf32>
    %151 = vector.shape_cast %148 : vector<4x16xf32> to vector<1x4x16xf32>
    tpu.vector_store %arg7[%c0_29, %c0_30, %c112], %151 {strides = array<i32>} : memref<1x4x128xf32, #tpu.memory_space<vmem>>, vector<1x4x16xf32>,
    return
  }
  func.func @transform_0(%arg0: i32) -> (i32, i32) {
    %c0_i32 = arith.constant 0 : i32
    %c0_i32_0 = arith.constant 0 : i32
    return %arg0, %c0_i32 : i32, i32
  }
  func.func @transform_1(%arg0: i32) -> (i32, i32, i32) {
    %c0_i32 = arith.constant 0 : i32
    %c0_i32_0 = arith.constant 0 : i32
    %c0_i32_1 = arith.constant 0 : i32
    return %arg0, %c0_i32, %c0_i32_0 : i32, i32, i32
  }
  func.func @transform_2(%arg0: i32) -> (i32, i32) {
    %c0_i32 = arith.constant 0 : i32
    %c0_i32_0 = arith.constant 0 : i32
    %c0_i32_1 = arith.constant 0 : i32
    return %c0_i32, %c0_i32_0 : i32, i32
  }
  func.func @transform_3(%arg0: i32) -> (i32, i32) {
    %c0_i32 = arith.constant 0 : i32
    %c0_i32_0 = arith.constant 0 : i32
    %c0_i32_1 = arith.constant 0 : i32
    return %c0_i32, %c0_i32_0 : i32, i32
  }
  func.func @transform_4(%arg0: i32) -> (i32, i32) {
    %c0_i32 = arith.constant 0 : i32
    %c0_i32_0 = arith.constant 0 : i32
    %c0_i32_1 = arith.constant 0 : i32
    return %c0_i32, %c0_i32_0 : i32, i32
  }
  func.func @transform_5(%arg0: i32) -> (i32, i32) {
    %c0_i32 = arith.constant 0 : i32
    %c0_i32_0 = arith.constant 0 : i32
    %c0_i32_1 = arith.constant 0 : i32
    return %c0_i32, %c0_i32_0 : i32, i32
  }
  func.func @transform_6(%arg0: i32) -> (i32, i32, i32) {
    %c0_i32 = arith.constant 0 : i32
    %c0_i32_0 = arith.constant 0 : i32
    %c0_i32_1 = arith.constant 0 : i32
    return %arg0, %c0_i32, %c0_i32_0 : i32, i32, i32
  }
}

</mosaic_0001>

<bundles_post_ra>
// kernel: gcn_forward.1
= control target key start
LH: loop header
LB: loop body
LE: loop exit
PB: predicated region body
PF: predicated region fallthrough
CT: control target
= control target key end

     0   :  { %s1405_s21 = smov 0   ;;  %s1832_s0 = inlined_call_operand.vmem [shape: f32[64,16], index: 0, kind: input, shape index: {}]   ;;  %s1833_s1 = inlined_call_operand.vmem [shape: f32[8,8,8], index: 1, kind: input, shape index: {}]   ;;  %s1834_s2 = inlined_call_operand.vmem [shape: f32[16,128], index: 2, kind: input, shape index: {}]   ;;  %s1835_s3 = inlined_call_operand.vmem [shape: f32[1,128], index: 3, kind: input, shape index: {}]   ;;  %s1836_s4 = inlined_call_operand.vmem [shape: f32[128,128], index: 4, kind: input, shape index: {}]   ;;  %s1837_s5 = inlined_call_operand.vmem [shape: f32[1,128], index: 5, kind: input, shape index: {}]   ;;  %s1838_s6 = inlined_call_operand.vmem [shape: f32[2,4,128], index: 6, kind: output, shape index: {}]  }
   0x1 LB: > { %s1411_s22 = sadd.s32 4294967295, %s1353_s21   ;;  %p1174_p0 = scmp.ge.s32.totalorder %s1353_s21, 1  ;;  %s1353_s21 = sphi %s1405_s21, %s16_s21  }
   0x2   : > { %p224_p1 = scmp.lt.s32.totalorder %s1353_s21, 3 }
   0x4   : > { %p225_p2 = pnand %p1174_p0, %p224_p1 }
   0x6   : > { %228 = sbr.rel (%p225_p2) target bundleno = 648 (0x288), region = 44 }
   0xd   : > { %v282_v0 = vld [vmem:[%s1834_s2] sm:$0xff]  ;;  %v283_v1 = vld [vmem:[%s1834_s2 + $0x8] sm:$0xff]  ;;  %s1175_s27 = sshll.u32 %s1411_s22, 2  ;;  %v1355_v3 = vmov 0   ;;  %vm284_vm0 = vcmask 130048   ;;  %v1356_v10 = vmov 1  }
   0xe   : > { %v1262_v2 = vpack.c.bf16 %v283_v1, %v282_v0  ;;  %1323 = vset.pattern.permute.xlu1 %v1355_v3  ;;  %p259_p3 = scmp.lt.s32.totalorder %s1175_s27, 7  ;;  %1321 = vset.pattern.permute.xlu0 %v1355_v3  ;;  %v1357_v11 = vmov 2   ;;  %v1358_v13 = vmov 3   ;;  %v1359_v15 = vmov 5   ;;  %v717_v19 = vld [vmem:[%s1836_s4] sm:$0xff]  ;;  %v718_v20 = vld [vmem:[%s1836_s4 + $0x8] sm:$0xff] }
   0xf   : > { %v1360_v16 = vmov 4   ;;  %v1361_v17 = vmov 7   ;;  %v1362_v18 = vmov 6   ;;  %v1266_v21 = vpack.c.bf16 %v718_v20, %v717_v19  ;;  %v719_v22 = vld [vmem:[%s1836_s4 + $0x10] sm:$0xff]  ;;  %v720_v23 = vld [vmem:[%s1836_s4 + $0x18] sm:$0xff]  ;;  %v721_v25 = vld [vmem:[%s1836_s4 + $0x20] sm:$0xff] }
  0x10   : > { %1263 = vmatprep.subr.bf16.mxu0 %v1262_v2  ;;  %s1858_s27 = smov (!%p259_p3, %s1175_s27), 7  ;;  %v1270_v24 = vpack.c.bf16 %v720_v23, %v719_v22  ;;  %v722_v26 = vld [vmem:[%s1836_s4 + $0x28] sm:$0xff]  ;;  %v723_v28 = vld [vmem:[%s1836_s4 + $0x30] sm:$0xff]  ;;  %v724_v29 = vld [vmem:[%s1836_s4 + $0x38] sm:$0xff]  ;;  %v402_v0 = vlaneseq  ;;  %vm1062_vm1 = vcmask 1047559   ;;  %vm1053_vm2 = vcmask 1046534  }
  0x11   : > { %1265 = vmatpush3.bf16.msra.mxu0 %v1262_v2  ;;  %s1176_s28 = sshll.u32 %s1858_s27, 3  ;;  %1267 = vmatprep.subr.bf16.mxu1 %v1266_v21  ;;  %v1274_v27 = vpack.c.bf16 %v722_v26, %v721_v25  ;;  %v1278_v30 = vpack.c.bf16 %v724_v29, %v723_v28  ;;  %v725_v31 = vld [vmem:[%s1836_s4 + $0x40] sm:$0xff]  ;;  %v726_v32 = vld [vmem:[%s1836_s4 + $0x48] sm:$0xff]  ;;  %v727_v34 = vld [vmem:[%s1836_s4 + $0x50] sm:$0xff]  ;;  %vm1022_vm3 = vcmask 1041409   ;;  %vm1025_vm4 = vcmask 1042434  }
  0x12   : > { %s1425_s7 = scalar_lea.vmem %s1833_s1, %s1176_s28  ;;  %s262_s10 = scalar_lea.vmem %s1832_s0, %s1176_s28  ;;  %1269 = vmatpush3.bf16.msra.mxu1 %v1266_v21  ;;  %v1282_v33 = vpack.c.bf16 %v726_v32, %v725_v31  ;;  %v728_v35 = vld [vmem:[%s1836_s4 + $0x58] sm:$0xff]  ;;  %v729_v37 = vld [vmem:[%s1836_s4 + $0x60] sm:$0xff]  ;;  %v730_v38 = vld [vmem:[%s1836_s4 + $0x68] sm:$0xff]  ;;  %vm1035_vm5 = vcmask 1044484   ;;  %vm1044_vm6 = vcmask 1045509   ;;  %vm1028_vm7 = vcmask 1043459  }
  0x13   : > { %v1431_v4 = vld [vmem:[%s1425_s7 + $0x8] sm:$0xff]  ;;  %v278_v5 = vld [vmem:[%s262_s10] sm:$0xff]  ;;  %v280_v7 = vld [vmem:[%s262_s10 + $0x10] sm:$0xff]  ;;  %1271 = vmatprep.subr.bf16.mxu1 %v1270_v24  ;;  %v1286_v36 = vpack.c.bf16 %v728_v35, %v727_v34  ;;  %v1290_v39 = vpack.c.bf16 %v730_v38, %v729_v37  ;;  %p270_p4 = scmp.lt.s32.totalorder %s1411_s22, 1  ;;  %s1363_s27 = smov 96   ;;  %vm1031_vm8 = vcmask 125952  }
  0x14   : > { %v279_v6 = vld [vmem:[%s262_s10 + $0x8] sm:$0xff]  ;;  %389 = vperm.xlu1 %1323, %v1431_v4   ;;  %1218 = vmatprep.mubr.msk.f32.mxu0 %vm284_vm0, %v278_v5  ;;  %v274_v8 = vld [vmem:[%s1425_s7] sm:$0xff]  ;;  %v281_v9 = vld [vmem:[%s262_s10 + $0x18] sm:$0xff]  ;;  %s1364_s28 = smov 80   ;;  %s1366_s9 = smov 16   ;;  %vm1040_vm9 = vcmask 258177  }
  0x15   : > { %1219 = vmatmul.mubr.msk.f32.vlgmr.msra.gmra.mrb[0].mxu0 %vm284_vm0, %v279_v6  ;;  %384 = vperm.xlu0 %1321, %v274_v8   ;;  %v1441_v12 = vld [vmem:[%s1425_s7 + $0x10] sm:$0xff]  ;;  %v277_v14 = vld [vmem:[%s1425_s7 + $0x18] sm:$0xff]  ;;  %s1860_s22 = smov (!%p270_p4, %s1411_s22), 1  ;;  %s1367_s10 = smov 112   ;;  %vm1049_vm10 = vcmask 390402   ;;  %vm1058_vm11 = vcmask 522627  }
  0x16   : > { %1221 = vmatprep.mubr.msk.f32.mxu0 %vm284_vm0, %v280_v7  ;;  %1273 = vmatpush3.bf16.msra.mxu1 %v1270_v24  ;;  %v731_v40 = vld [vmem:[%s1836_s4 + $0x70] sm:$0xff]  ;;  %v732_v41 = vld [vmem:[%s1836_s4 + $0x78] sm:$0xff]  ;;  %s1179_s29 = sshll.u32 %s1860_s22, 2  ;;  %s1365_s22 = smov 48   ;;  %vm1067_vm12 = vcmask 654852   ;;  %vm1077_vm13 = vcmask 786053  }
  0x17   : > { %1275 = vmatprep.subr.bf16.mxu1 %v1274_v27  ;;  %v1294_v42 = vpack.c.bf16 %v732_v41, %v731_v40  ;;  %s1802_s8 = scalar_lea.vmem %s1838_s6, %s1179_s29  ;;  %s1368_s11 = smov 32   ;;  %vm1079_vm14 = vcmask 778880   ;;  %vm1089_vm15 = vcmask 917254  }
  0x18   : > { %1324 = vset.pattern.permute.xlu1 %v1356_v10  ;;  %s1369_s12 = smov 64  }
  0x19   : > { %427 = vperm.xlu1 %1324, %v1431_v4   ;;  %1222 = vmatmul.mubr.msk.f32.gmra.mrb[2].mxu0 %vm284_vm0, %v281_v9  ;;  %vm1091_vm0 = vcmask 911104  }
  0x1a   : > { %1322 = vset.pattern.permute.xlu0 %v1356_v10  ;;  %1277 = vmatpush3.bf16.msra.mxu1 %v1274_v27 }
  0x1b   : > { %423 = vperm.xlu0 %1322, %v274_v8   ;;  %1279 = vmatprep.subr.bf16.mxu1 %v1278_v30 }
  0x1d   : > { %1325 = vset.pattern.permute.xlu1 %v1357_v11 }
  0x1e   : > { %463 = vperm.xlu1 %1325, %v274_v8   ;;  %1281 = vmatpush3.bf16.msra.mxu1 %v1278_v30 }
  0x1f   : > { %1326 = vset.pattern.permute.xlu0 %v1357_v11  ;;  %1283 = vmatprep.subr.bf16.mxu1 %v1282_v33 }
  0x20   : > { %467 = vperm.xlu0 %1326, %v1431_v4  }
  0x22   : > { %1327 = vset.pattern.permute.xlu1 %v1355_v3  ;;  %1285 = vmatpush3.bf16.msra.mxu1 %v1282_v33 }
  0x23   : > { %394 = vperm.xlu1 %1327, %v1441_v12   ;;  %1287 = vmatprep.subr.bf16.mxu1 %v1286_v36 }
  0x24   : > { %1329 = vset.pattern.permute.xlu0 %v1358_v13 }
  0x25   : > { %503 = vperm.xlu0 %1329, %v274_v8  }
  0x26   : > { %1289 = vmatpush3.bf16.msra.mxu1 %v1286_v36 }
  0x27   : > { %1328 = vset.pattern.permute.xlu1 %v1356_v10  ;;  %1291 = vmatprep.subr.bf16.mxu1 %v1290_v39 }
  0x28   : > { %431 = vperm.xlu1 %1328, %v1441_v12  }
  0x29   : > { %507 = vperm.xlu0 %1329, %v1431_v4  }
  0x2a   : > { %1293 = vmatpush3.bf16.msra.mxu1 %v1290_v39 }
  0x2b   : > { %1295 = vmatprep.subr.bf16.mxu1 %v1294_v42 }
  0x2c   : > { %1330 = vset.pattern.permute.xlu1 %v1355_v3  ;;  %v403_v3 = vshrl.u32 %v402_v0, 7 }
  0x2d   : > { %399 = vperm.xlu1 %1330, %v277_v14   ;;  %511 = vperm.xlu0 %1329, %v1441_v12  }
  0x2e   : > { %1297 = vmatpush3.bf16.msra.mxu1 %v1294_v42  ;;  %v1556_v6 = vsub.s32 0, %v403_v3  ;;  %v1558_v7 = vsub.s32 1, %v403_v3 }
  0x31   : > { %1331 = vset.pattern.permute.xlu1 %v1356_v10  ;;  %1336 = vset.pattern.permute.xlu0 %v1359_v15  ;;  %v1564_v10 = vsub.s32 2, %v403_v3 }
  0x32   : > { %435 = vperm.xlu1 %1331, %v277_v14   ;;  %587 = vperm.xlu0 %1336, %v1431_v4  }
  0x36   : > { %1332 = vset.pattern.permute.xlu1 %v1357_v11  ;;  %1337 = vset.pattern.permute.xlu0 %v1360_v16  ;;  %v1566_v11 = vsub.s32 3, %v403_v3 }
  0x37   : > { %471 = vperm.xlu1 %1332, %v1441_v12   ;;  %543 = vperm.xlu0 %1337, %v274_v8  }
  0x3b   : > { %475 = vperm.xlu1 %1332, %v277_v14   ;;  %555 = vperm.xlu0 %1337, %v277_v14  }
  0x3f   : > { %1333 = vset.pattern.permute.xlu1 %v1360_v16  ;;  %1341 = vset.pattern.permute.xlu0 %v1361_v17 }
  0x40   : > { %547 = vperm.xlu1 %1333, %v1431_v4   ;;  %663 = vperm.xlu0 %1341, %v274_v8  }
  0x44   : > { %1334 = vset.pattern.permute.xlu1 %v1359_v15  ;;  %1343 = vset.pattern.permute.xlu0 %v1362_v18 }
  0x45   : > { %583 = vperm.xlu1 %1334, %v274_v8   ;;  %631 = vperm.xlu0 %1343, %v1441_v12  }
  0x49   : > { %1335 = vset.pattern.permute.xlu1 %v1358_v13  ;;  %1346 = vset.pattern.permute.xlu0 %v1361_v17  ;;  %v1570_v13 = vsub.s32 5, %v403_v3 }
  0x4a   : > { %515 = vperm.xlu1 %1335, %v277_v14   ;;  %675 = vperm.xlu0 %1346, %v277_v14  }
  0x4e   : > { %1338 = vset.pattern.permute.xlu1 %v1360_v16 }
  0x4f   : > { %551 = vperm.xlu1 %1338, %v1441_v12  }
  0x53   : > { %1339 = vset.pattern.permute.xlu1 %v1362_v18 }
  0x54   : > { %623 = vperm.xlu1 %1339, %v274_v8  }
  0x58   : > { %627 = vperm.xlu1 %1339, %v1431_v4  }
  0x5c   : > { %1340 = vset.pattern.permute.xlu1 %v1359_v15 }
  0x5d   : > { %591 = vperm.xlu1 %1340, %v1441_v12  }
  0x61   : > { %595 = vperm.xlu1 %1340, %v277_v14  }
  0x65   : > { %1342 = vset.pattern.permute.xlu1 %v1361_v17 }
  0x66   : > { %667 = vperm.xlu1 %1342, %v1431_v4  }
  0x6a   : > { %1344 = vset.pattern.permute.xlu1 %v1362_v18  ;;  %v1580_v18 = vsub.s32 7, %v403_v3 }
  0x6b   : > { %635 = vperm.xlu1 %1344, %v277_v14   ;;  %v1572_v14 = vsub.s32 6, %v403_v3 }
  0x6f   : > { %1345 = vset.pattern.permute.xlu1 %v1361_v17 }
  0x70   : > { %671 = vperm.xlu1 %1345, %v1441_v12   ;;  %v1568_v12 = vsub.s32 4, %v403_v3 }
  0x93   : > { %v1506_v43 = vpop.permute.xlu1 %389 }
  0x94   : > { %v1524_v52 = vpop.permute.xlu0 %384 }
  0x98   : > { %v1508_v44 = vpop.permute.xlu1 %427 }
  0x9a   : > { %v1528_v54 = vpop.permute.xlu0 %423 }
  0x9d   : > { %v1510_v45 = vpop.permute.xlu1 %463 }
  0x9f   : > { %v1532_v56 = vpop.permute.xlu0 %467 }
  0xa2   : > { %v1512_v46 = vpop.permute.xlu1 %394 }
  0xa3   : > { %1845 = vst [vmem:[#allocation2_spill] sm:$0xff] %v1512_v46 }
  0xa4   : > { %v1536_v58 = vpop.permute.xlu0 %503 }
  0xa7   : > { %v1514_v47 = vpop.permute.xlu1 %431 }
  0xa8   : > { %1846 = vst [vmem:[#allocation3_spill] sm:$0xff] %v1514_v47  ;;  %v1540_v60 = vpop.permute.xlu0 %507 }
  0xac   : > { %v1516_v48 = vpop.permute.xlu1 %399  ;;  %v1544_v62 = vpop.permute.xlu0 %511 }
  0xad   : > { %1849 = vst [vmem:[#allocation6_spill] sm:$0xff] %v1544_v62 }
  0xb1   : > { %v1518_v49 = vpop.permute.xlu1 %435  ;;  %v1548_v1 = vpop.permute.xlu0 %587 }
  0xb6   : > { %v1520_v50 = vpop.permute.xlu1 %471  ;;  %v1552_v4 = vpop.permute.xlu0 %543 }
  0xb7   : > { %1847 = vst [vmem:[#allocation4_spill] sm:$0xff] %v1520_v50 }
  0xba   : > { %v1522_v51 = vpop.permute.xlu1 %475  ;;  %v1594_v25 = vpop.permute.xlu0 %555 }
  0xbb   : > { %1850 = vst [vmem:[#allocation7_spill] sm:$0xff] %v1594_v25 }
  0xbf   : > { %v1526_v53 = vpop.permute.xlu1 %547 }
  0xc4   : > { %v1530_v55 = vpop.permute.xlu1 %583 }
  0xc9   : > { %v1534_v57 = vpop.permute.xlu1 %515 }
  0xce   : > { %v1538_v59 = vpop.permute.xlu1 %551 }
  0xcf   : > { %1848 = vst [vmem:[#allocation5_spill] sm:$0xff] %v1538_v59 }
  0xd3   : > { %v1542_v61 = vpop.permute.xlu1 %623 }
  0xd7   : > { %v1546_v63 = vpop.permute.xlu1 %627 }
  0xdc   : > { %v1550_v2 = vpop.permute.xlu1 %591 }
  0xe0   : > { %v1562_v9 = vpop.permute.xlu1 %595 }
  0xe5   : > { %v1610_v34 = vpop.permute.xlu1 %667 }
  0xe8   : > { %v1554_v5 = vpop.f32.mrb[0].mxu0 }
  0xe9   : > { %v1560_v8 = vpop.f32.mrb[1].mxu0  ;;  %v409_v15 = vrot.slane %v1554_v5, %v1556_v6  ;;  %v445_v16 = vrot.slane %v1554_v5, %v1558_v7  ;;  %v485_v26 = vrot.slane %v1554_v5, %v1564_v10  ;;  %v525_v33 = vrot.slane %v1554_v5, %v1566_v11 }
  0xea   : > { %v405_v19 = vrot.slane %v1560_v8, %v1556_v6  ;;  %v441_v24 = vrot.slane %v1560_v8, %v1558_v7  ;;  %v481_v38 = vrot.slane %v1560_v8, %v1564_v10 }
  0xec   : > { %v1578_v17 = vpop.f32.mrb[2].mxu0  ;;  %v418_v41 = vmul.f32 %v405_v19, %v1524_v52  ;;  %v454_v42 = vmul.f32 %v441_v24, %v1528_v54 }
  0xed   : > { %v1584_v20 = vpop.f32.mrb[3].mxu0  ;;  %v417_v21 = vrot.slane %v1578_v17, %v1556_v6  ;;  %v453_v22 = vrot.slane %v1578_v17, %v1558_v7  ;;  %v493_v23 = vrot.slane %v1578_v17, %v1564_v10  ;;  %v533_v32 = vrot.slane %v1578_v17, %v1566_v11 }
  0xee   : > { %v413_v27 = vrot.slane %v1584_v20, %v1556_v6  ;;  %v449_v28 = vrot.slane %v1584_v20, %v1558_v7  ;;  %v489_v29 = vrot.slane %v1584_v20, %v1564_v10  ;;  %v529_v37 = vrot.slane %v1584_v20, %v1566_v11 }
  0xef   : > { %v421_v30 = vmul.f32 %v417_v21, %v1516_v48  ;;  %v457_v31 = vmul.f32 %v453_v22, %v1518_v49  ;;  %v497_v40 = vmul.f32 %v493_v23, %v1522_v51  ;;  %v521_v21 = vrot.slane %v1560_v8, %v1566_v11  ;;  %v1631_v23 = vpop.permute.xlu0 %663 }
  0xf0   : > { %v420_v35 = vmul.f32 %v413_v27, %v1512_v46  ;;  %v456_v36 = vmul.f32 %v449_v28, %v1514_v47  ;;  %v496_v3 = vmul.f32 %v489_v29, %v1520_v50  ;;  %v561_v22 = vrot.slane %v1560_v8, %v1568_v12  ;;  %v1641_v50 = vpop.permute.xlu1 %635 }
  0xf1   : > { %v461_v39 = vadd.f32 %v457_v31, %v421_v30  ;;  %v537_v28 = vmul.f32 %v533_v32, %v1534_v57  ;;  %v573_v30 = vrot.slane %v1578_v17, %v1568_v12  ;;  %v569_v19 = vrot.slane %v1584_v20, %v1568_v12 }
  0xf2   : > { %v460_v0 = vadd.f32 %v456_v36, %v420_v35  ;;  %v536_v29 = vmul.f32 %v529_v37, %v1544_v62  ;;  %v609_v31 = vrot.slane %v1584_v20, %v1570_v13  ;;  %v601_v35 = vrot.slane %v1560_v8, %v1570_v13 }
  0xf3   : > { %v501_v27 = vadd.f32 %v497_v40, %v461_v39  ;;  %v458_v39 = vadd.f32 %v454_v42, %v418_v41  ;;  %v494_v32 = vmul.f32 %v481_v38, %v1510_v45  ;;  %v641_v40 = vrot.slane %v1560_v8, %v1572_v14 }
  0xf4   : > { %v500_v24 = vadd.f32 %v496_v3, %v460_v0  ;;  %v576_v0 = vmul.f32 %v569_v19, %v1538_v59  ;;  %v534_v37 = vmul.f32 %v521_v21, %v1536_v58  ;;  %v681_v3 = vrot.slane %v1560_v8, %v1580_v18  ;;  %v1658_v59 = vpop.permute.xlu0 %631 }
  0xf5   : > { %v541_v36 = vadd.f32 %v537_v28, %v501_v27  ;;  %v577_v62 = vmul.f32 %v573_v30, %v1594_v25  ;;  %v613_v41 = vrot.slane %v1578_v17, %v1570_v13  ;;  %v649_v38 = vrot.slane %v1584_v20, %v1572_v14 }
  0xf6   : > { %v540_v47 = vadd.f32 %v536_v29, %v500_v24  ;;  %v498_v42 = vadd.f32 %v494_v32, %v458_v39  ;;  %v616_v28 = vmul.f32 %v609_v31, %v1550_v2  ;;  %v419_v24 = vmul.f32 %v409_v15, %v1506_v43 }
  0xf7   : > { %v455_v19 = vmul.f32 %v445_v16, %v1508_v44  ;;  %v581_v21 = vadd.f32 %v577_v62, %v541_v36  ;;  %v653_v8 = vrot.slane %v1578_v17, %v1572_v14  ;;  %v574_v30 = vmul.f32 %v561_v22, %v1552_v4  ;;  %v1668_v22 = vpop.permute.xlu1 %671 }
  0xf8   : > { %v580_v27 = vadd.f32 %v576_v0, %v540_v47  ;;  %v538_v29 = vadd.f32 %v534_v37, %v498_v42  ;;  %v495_v39 = vmul.f32 %v485_v26, %v1532_v56  ;;  %v565_v47 = vrot.slane %v1554_v5, %v1568_v12 }
  0xf9   : > { %v459_v46 = vadd.f32 %v455_v19, %v419_v24  ;;  %v656_v15 = vmul.f32 %v649_v38, %v1658_v59  ;;  %v689_v62 = vrot.slane %v1584_v20, %v1580_v18  ;;  %v614_v31 = vmul.f32 %v601_v35, %v1530_v55 }
  0xfa   : > { %v620_v25 = vadd.f32 %v616_v28, %v580_v27  ;;  %v578_v16 = vadd.f32 %v574_v30, %v538_v29  ;;  %v617_v36 = vmul.f32 %v613_v41, %v1562_v9  ;;  %v535_v0 = vmul.f32 %v525_v33, %v1540_v60  ;;  %v1688_v30 = vpop.permute.xlu0 %675 }
  0xfb   : > { %v499_v32 = vadd.f32 %v495_v39, %v459_v46  ;;  %v605_v26 = vrot.slane %v1554_v5, %v1570_v13  ;;  %v654_v38 = vmul.f32 %v641_v40, %v1542_v61  ;;  %v575_v20 = vmul.f32 %v565_v47, %v1526_v53  ;;  %v1184_v40 = vld [vmem:[%s1835_s3] ss:$0 sm:$0xff] }
  0xfc   : > { %v660_v37 = vadd.f32 %v656_v15, %v620_v25  ;;  %v618_v42 = vadd.f32 %v614_v31, %v578_v16  ;;  %v621_v27 = vadd.f32 %v617_v36, %v581_v21  ;;  %v645_v35 = vrot.slane %v1554_v5, %v1572_v14 }
  0xfd   : > { %v539_v28 = vadd.f32 %v535_v0, %v499_v32  ;;  %v693_v41 = vrot.slane %v1578_v17, %v1580_v18  ;;  %v696_v46 = vmul.f32 %v689_v62, %v1668_v22  ;;  %v694_v24 = vmul.f32 %v681_v3, %v1631_v23 }
  0xfe   : > { %v658_v33 = vadd.f32 %v654_v38, %v618_v42  ;;  %v657_v25 = vmul.f32 %v653_v8, %v1641_v50  ;;  %v615_v21 = vmul.f32 %v605_v26, %v1548_v1  ;;  %v685_v29 = vrot.slane %v1554_v5, %v1580_v18 }
  0xff   : > { %v579_v19 = vadd.f32 %v575_v20, %v539_v28  ;;  %v700_v17 = vadd.f32 %v696_v46, %v660_v37  ;;  %v655_v3 = vmul.f32 %v645_v35, %v1546_v63  ;;  %v697_v8 = vmul.f32 %v693_v41, %v1688_v30 }
 0x100   : > { %v698_v39 = vadd.f32 %v694_v24, %v658_v33  ;;  %v661_v47 = vadd.f32 %v657_v25, %v621_v27  ;;  %v695_v31 = vmul.f32 %v685_v29, %v1610_v34 }
 0x101   : > { %v619_v15 = vadd.f32 %v615_v21, %v579_v19  ;;  %v711_v32 = vadd.f32 %v1184_v40, %v700_v17 }
 0x102   : > { %v709_v62 = vadd.f32 %v1184_v40, %v698_v39  ;;  %v701_v0 = vadd.f32 %v697_v8, %v661_v47 }
 0x103   : > { %v659_v16 = vadd.f32 %v655_v3, %v619_v15  ;;  %v715_v42 = vmax.f32 %v711_v32, 0.0 }
 0x104   : > { %v713_v36 = vmax.f32 %v709_v62, 0.0  ;;  %v712_v37 = vadd.f32 %v1184_v40, %v701_v0 }
 0x105   : > { %v699_v26 = vadd.f32 %v695_v31, %v659_v16 }
 0x106   : > { %1256 = vmatprep.mubr.f32.mxu1 %v713_v36  ;;  %v716_v27 = vmax.f32 %v712_v37, 0.0 }
 0x107   : > { %v710_v5 = vadd.f32 %v1184_v40, %v699_v26 }
 0x109   : > { %v714_v38 = vmax.f32 %v710_v5, 0.0 }
 0x10b   : > { %1257 = vmatmul.mubr.f32.vlgmr.msra.gmra.mrb[0].mxu1 %v714_v38 }
 0x10c   : > { %1259 = vmatprep.mubr.f32.mxu1 %v715_v42 }
 0x10f   : > { %1260 = vmatmul.mubr.f32.gmra.mrb[2].mxu1 %v716_v27 }
 0x1de   : > { %v1258_v28 = vpop.f32.mrb[0].mxu1 }
 0x1df   : > { %v825_v20 = vrot.slane %v1258_v28, %v1556_v6  ;;  %v845_v35 = vrot.slane %v1258_v28, %v1558_v7  ;;  %v869_v41 = vrot.slane %v1258_v28, %v1564_v10  ;;  %v1696_v46 = vpop.f32.mrb[1].mxu1  ;;  %v893_v33 = vrot.slane %v1258_v28, %v1566_v11 }
 0x1e0   : > { %v917_v40 = vrot.slane %v1258_v28, %v1568_v12  ;;  %v941_v21 = vrot.slane %v1258_v28, %v1570_v13  ;;  %v821_v39 = vrot.slane %v1696_v46, %v1556_v6  ;;  %v841_v47 = vrot.slane %v1696_v46, %v1558_v7 }
 0x1e1   : > { %v835_v24 = vmul.f32 %v825_v20, %v1506_v43  ;;  %v855_v25 = vmul.f32 %v845_v35, %v1508_v44  ;;  %v879_v19 = vmul.f32 %v869_v41, %v1532_v56  ;;  %v865_v43 = vrot.slane %v1696_v46, %v1564_v10 }
 0x1e2   : > { %v1704_v29 = vpop.f32.mrb[2].mxu1  ;;  %v903_v44 = vmul.f32 %v893_v33, %v1540_v60  ;;  %v965_v56 = vrot.slane %v1258_v28, %v1572_v14  ;;  %v989_v3 = vrot.slane %v1258_v28, %v1580_v18  ;;  %v889_v62 = vrot.slane %v1696_v46, %v1566_v11 }
 0x1e3   : > { %v859_v17 = vadd.f32 %v855_v25, %v835_v24  ;;  %v1712_v15 = vpop.f32.mrb[3].mxu1  ;;  %v927_v16 = vmul.f32 %v917_v40, %v1526_v53  ;;  %v834_v31 = vmul.f32 %v821_v39, %v1524_v52  ;;  %v854_v36 = vmul.f32 %v841_v47, %v1528_v54  ;;  %v1852_v47 = vld [vmem:[#allocation3_spill] sm:$0xff] }
 0x1e4   : > { %v951_v32 = vmul.f32 %v941_v21, %v1548_v1  ;;  %v913_v0 = vrot.slane %v1696_v46, %v1568_v12  ;;  %v937_v60 = vrot.slane %v1696_v46, %v1570_v13  ;;  %v961_v26 = vrot.slane %v1696_v46, %v1572_v14 }
 0x1e5   : > { %v883_v8 = vadd.f32 %v879_v19, %v859_v17  ;;  %v858_v42 = vadd.f32 %v854_v36, %v834_v31  ;;  %v878_v38 = vmul.f32 %v865_v43, %v1510_v45  ;;  %v833_v52 = vrot.slane %v1704_v29, %v1556_v6  ;;  %v1185_v31 = vld [vmem:[%s1837_s5] ss:$0 sm:$0xff] }
 0x1e6   : > { %v975_v53 = vmul.f32 %v965_v56, %v1546_v63  ;;  %v902_v54 = vmul.f32 %v889_v62, %v1536_v58  ;;  %v853_v1 = vrot.slane %v1704_v29, %v1558_v7  ;;  %v877_v37 = vrot.slane %v1704_v29, %v1564_v10 }
 0x1e7   : > { %v907_v5 = vadd.f32 %v903_v44, %v883_v8  ;;  %v882_v28 = vadd.f32 %v878_v38, %v858_v42  ;;  %v837_v20 = vmul.f32 %v833_v52, %v1516_v48  ;;  %v901_v45 = vrot.slane %v1704_v29, %v1566_v11 }
 0x1e8   : > { %v999_v35 = vmul.f32 %v989_v3, %v1610_v34  ;;  %v926_v41 = vmul.f32 %v913_v0, %v1552_v4  ;;  %v950_v63 = vmul.f32 %v937_v60, %v1530_v55  ;;  %v857_v58 = vmul.f32 %v853_v1, %v1518_v49  ;;  %v1853_v3 = vld [vmem:[#allocation7_spill] sm:$0xff]  ;;  %v1854_v0 = vld [vmem:[#allocation4_spill] sm:$0xff] }
 0x1e9   : > { %v931_v27 = vadd.f32 %v927_v16, %v907_v5  ;;  %v906_v24 = vadd.f32 %v902_v54, %v882_v28  ;;  %v974_v25 = vmul.f32 %v961_v26, %v1542_v61  ;;  %v925_v40 = vrot.slane %v1704_v29, %v1568_v12 }
 0x1ea   : > { %v861_v19 = vadd.f32 %v857_v58, %v837_v20  ;;  %v881_v48 = vmul.f32 %v877_v37, %v1522_v51  ;;  %v829_v21 = vrot.slane %v1712_v15, %v1556_v6  ;;  %v849_v4 = vrot.slane %v1712_v15, %v1558_v7  ;;  %v1851_v6 = vld [vmem:[#allocation2_spill] sm:$0xff] }
 0x1eb   : > { %v955_v33 = vadd.f32 %v951_v32, %v931_v27  ;;  %v930_v55 = vadd.f32 %v926_v41, %v906_v24  ;;  %v985_v61 = vrot.slane %v1696_v46, %v1580_v18  ;;  %v905_v34 = vmul.f32 %v901_v45, %v1534_v57  ;;  %v1856_v27 = vld [vmem:[#allocation5_spill] sm:$0xff] }
 0x1ec   : > { %v885_v17 = vadd.f32 %v881_v48, %v861_v19  ;;  %v949_v51 = vrot.slane %v1704_v29, %v1570_v13  ;;  %v836_v39 = vmul.f32 %v829_v21, %v1851_v6  ;;  %v856_v7 = vmul.f32 %v849_v4, %v1852_v47 }
 0x1ed   : > { %v979_v49 = vadd.f32 %v975_v53, %v955_v33  ;;  %v954_v44 = vadd.f32 %v950_v63, %v930_v55  ;;  %v873_v56 = vrot.slane %v1712_v15, %v1564_v10  ;;  %v897_v46 = vrot.slane %v1712_v15, %v1566_v11  ;;  %v1855_v53 = vld [vmem:[#allocation6_spill] sm:$0xff] }
 0x1ee   : > { %v909_v57 = vadd.f32 %v905_v34, %v885_v17  ;;  %v929_v62 = vmul.f32 %v925_v40, %v1853_v3  ;;  %v973_v8 = vrot.slane %v1704_v29, %v1572_v14  ;;  %v860_v16 = vadd.f32 %v856_v7, %v836_v39 }
 0x1ef   : > { %v1003_v43 = vadd.f32 %v999_v35, %v979_v49  ;;  %v978_v36 = vadd.f32 %v974_v25, %v954_v44  ;;  %v998_v32 = vmul.f32 %v985_v61, %v1631_v23  ;;  %v880_v60 = vmul.f32 %v873_v56, %v1854_v0 }
 0x1f0   : > { %v921_v10 = vrot.slane %v1712_v15, %v1568_v12  ;;  %v933_v11 = vadd.f32 %v929_v62, %v909_v57  ;;  %v953_v26 = vmul.f32 %v949_v51, %v1562_v9  ;;  %v997_v5 = vrot.slane %v1704_v29, %v1580_v18 }
 0x1f1   : > { %v945_v42 = vrot.slane %v1712_v15, %v1570_v13  ;;  %v1002_v38 = vadd.f32 %v998_v32, %v978_v36  ;;  %v884_v52 = vadd.f32 %v880_v60, %v860_v16  ;;  %v904_v54 = vmul.f32 %v897_v46, %v1855_v53 }
 0x1f2   : > { %v1014_v1 = vadd.f32 %v1185_v31, %v1003_v43  ;;  %v957_v23 = vadd.f32 %v953_v26, %v933_v11  ;;  %v977_v37 = vmul.f32 %v973_v8, %v1641_v50  ;;  %v969_v12 = vrot.slane %v1712_v15, %v1572_v14 }
 0x1f3   : > { %v908_v9 = vadd.f32 %v904_v54, %v884_v52  ;;  %v928_v28 = vmul.f32 %v921_v10, %v1856_v27  ;;  %v1013_v29 = vadd.f32 %v1185_v31, %v1002_v38  ;;  %v1001_v13 = vmul.f32 %v997_v5, %v1688_v30 }
 0x1f4   : > { %v1021_v20 = vrot.slane %v1014_v1, 7  ;;  %v981_v45 = vadd.f32 %v977_v37, %v957_v23  ;;  %v952_v35 = vmul.f32 %v945_v42, %v1550_v2  ;;  %v993_v41 = vrot.slane %v1712_v15, %v1580_v18 }
 0x1f5   : > { %v932_v63 = vadd.f32 %v928_v28, %v908_v9  ;;  %v976_v18 = vmul.f32 %v969_v12, %v1658_v59 }
 0x1f6   : > { %v1081_v50 = vsel %vm1062_vm1, %v1021_v20, %v1013_v29  ;;  %v1069_v14 = vsel %vm1053_vm2, %v1021_v20, %v1013_v29  ;;  %v1023_v58 = vsel %vm1022_vm3, %v1021_v20, %v1013_v29  ;;  %v1005_v33 = vadd.f32 %v1001_v13, %v981_v45 }
 0x1f7   : > { %1083 = vrot.lane.b32.xlu0 %v1081_v50, %s1363_s27  ;;  %v1051_v24 = vsel %vm1035_vm5, %v1021_v20, %v1013_v29  ;;  %v1033_v30 = vsel %vm1025_vm4, %v1021_v20, %v1013_v29  ;;  %v1042_v2 = vsel %vm1028_vm7, %v1021_v20, %v1013_v29  ;;  %v956_v25 = vadd.f32 %v952_v35, %v932_v63 }
 0x1f8   : > { %v1060_v15 = vsel %vm1044_vm6, %v1021_v20, %v1013_v29  ;;  %v1016_v40 = vadd.f32 %v1185_v31, %v1005_v33  ;;  %v1000_v48 = vmul.f32 %v993_v41, %v1668_v22 }
 0x1f9   : > { %v980_v19 = vadd.f32 %v976_v18, %v956_v25 }
 0x1fa   : > { %v1027_v21 = vrot.slane %v1016_v40, 5 }
 0x1fb   : > { %v1004_v4 = vadd.f32 %v1000_v48, %v980_v19 }
 0x1fc   : > { %1073 = vrot.lane.b32.xlu1 %v1027_v21, %s1364_s28 }
 0x1fd   : > { %v1015_v49 = vadd.f32 %v1185_v31, %v1004_v4 }
 0x1ff   : > { %v1024_v55 = vrot.slane %v1015_v49, 6 }
 0x201   : > { %v1070_v59 = vsel %vm1062_vm1, %v1024_v55, %v1069_v14  ;;  %v1082_v61 = vsel %vm1022_vm3, %v1027_v21, %v1024_v55  ;;  %v1026_v22 = vsel %vm1025_vm4, %v1024_v55, %v1023_v58  ;;  %v1052_v34 = vsel %vm1044_vm6, %v1024_v55, %v1051_v24 }
 0x202   : > { %1071 = vrot.lane.b32.xlu0 %v1070_v59, %s1364_s28  ;;  %1085 = vrot.lane.b32.xlu1 %v1082_v61, %s1363_s27  ;;  %v1054_v17 = vsel %vm1053_vm2, %v1027_v21, %v1052_v34  ;;  %v1034_v51 = vsel %vm1028_vm7, %v1024_v55, %v1033_v30  ;;  %v1029_v6 = vsel %vm1028_vm7, %v1027_v21, %v1026_v22 }
 0x203   : > { %v1036_v39 = vsel %vm1035_vm5, %v1027_v21, %v1034_v51  ;;  %v1043_v47 = vsel %vm1035_vm5, %v1024_v55, %v1042_v2  ;;  %v1061_v7 = vsel %vm1053_vm2, %v1024_v55, %v1060_v15  ;;  %v1093_v43 = vsel %vm1022_vm3, %v1024_v55, %v1021_v20  ;;  %1032 = vst.msk [vmem:[%s1802_s8] sm:$0xf] %vm1031_vm8, %v1029_v6 }
 0x204   : > { %v1045_v44 = vsel %vm1044_vm6, %v1027_v21, %v1043_v47  ;;  %v1063_v56 = vsel %vm1062_vm1, %v1027_v21, %v1061_v7  ;;  %v1094_v46 = vsel %vm1025_vm4, %v1027_v21, %v1093_v43  ;;  %vm1101_vm1 = vcmask 1048455  }
 0x205   : > { %vm1103_vm2 = vcmask 1043328  }
 0x206   : > { %1055 = vrot.lane.b32.xlu0 %v1054_v17, %s1365_s22  ;;  %1037 = vrot.lane.b32.xlu1 %v1036_v39, %s1366_s9 }
 0x20a   : > { %1095 = vrot.lane.b32.xlu0 %v1013_v29, %s1367_s10  ;;  %1046 = vrot.lane.b32.xlu1 %v1045_v44, %s1368_s11 }
 0x20e   : > { %1064 = vrot.lane.b32.xlu1 %v1063_v56, %s1369_s12 }
 0x212   : > { %1097 = vrot.lane.b32.xlu1 %v1094_v46, %s1367_s10 }
 0x269   : > { %v1084_v3 = vpop.permute.xlu0 %1083 }
 0x26e   : > { %v1074_v57 = vpop.permute.xlu1 %1073 }
 0x274   : > { %v1086_v62 = vpop.permute.xlu1 %1085  ;;  %v1072_v8 = vpop.permute.xlu0 %1071 }
 0x278   : > { %v1038_v16 = vpop.permute.xlu1 %1037  ;;  %v1056_v36 = vpop.permute.xlu0 %1055 }
 0x279   : > { %1041 = vst.msk [vmem:[%s1802_s8 - $0x1] sm:$0x1e] %vm1040_vm9, %v1038_v16 }
 0x27c   : > { %v1047_v31 = vpop.permute.xlu1 %1046  ;;  %v1096_v0 = vpop.permute.xlu0 %1095 }
 0x27d   : > { %1050 = vst.msk [vmem:[%s1802_s8 - $0x2] sm:$0x3c] %vm1049_vm10, %v1047_v31 }
 0x27e   : > { %1059 = vst.msk [vmem:[%s1802_s8 - $0x3] sm:$0x78] %vm1058_vm11, %v1056_v36 }
 0x280   : > { %v1065_v32 = vpop.permute.xlu1 %1064 }
 0x281   : > { %1068 = vst.msk [vmem:[%s1802_s8 - $0x4] sm:$0xf0] %vm1067_vm12, %v1065_v32 }
 0x282   : > { %1078 = vst.msk [vmem:[%s1802_s8 - $0x5] sm:$0xe0] %vm1077_vm13, %v1072_v8 }
 0x283   : > { %1080 = vst.msk [vmem:[%s1802_s8 + $0x3] sm:$0x1] %vm1079_vm14, %v1074_v57 }
 0x284   : > { %1090 = vst.msk [vmem:[%s1802_s8 - $0x6] sm:$0xc0] %vm1089_vm15, %v1084_v3  ;;  %v1098_v60 = vpop.permute.xlu1 %1097 }
 0x285   : > { %1092 = vst.msk [vmem:[%s1802_s8 + $0x2] sm:$0x3] %vm1091_vm0, %v1086_v62 }
 0x286   : > { %1102 = vst.msk [vmem:[%s1802_s8 - $0x7] sm:$0x80] %vm1101_vm1, %v1096_v0 }
 0x287   : > { %1104 = vst.msk [vmem:[%s1802_s8 + $0x1] sm:$0x7] %vm1103_vm2, %v1098_v60 }
 0x288 PF: > { %s16_s21 = sadd.s32 1, %s1353_s21  }
 0x289   : > { %p13_p5 = scmp.ge.s32.totalorder %s16_s21, 4  }
 0x28b   :  { %15 = sbr.rel (!%p13_p5) target bundleno = 1 (0x1), region = 77 }

</bundles_post_ra>
